<compile_context>
chip_gen: v7x
topology: tpu7x:2x2x1
jax: 0.10.0
libtpu: 0.0.40
codegen_flags: <defaults>
</compile_context>

<pallas_src>
import functools

import jax
import jax.numpy as jnp
from jax.experimental import pallas as pl
from jax.experimental.pallas import tpu as pltpu


def _round_up(x, m):
    return (x + m - 1) // m * m


def classifier_kernel(x_ref, wc_ref, bc_ref, poolw_ref, wf_ref, bf_ref,
                      out_ref, *, inv_hw):
    """One grid step = one image.

    x_ref     : (1, HWpad, Kc) bf16  im2col'ed activations (zero padded)
    wc_ref    : (Kc, Cpad)     bf16  folded 3x3 conv weights (K = 9*Cin, padded)
    bc_ref    : (1, Cpad)      f32   conv bias
    poolw_ref : (1, HWpad)     bf16  1.0 on valid spatial rows, 0.0 on padding
    wf_ref    : (Cpad, Kfc)    bf16  FC weights
    bf_ref    : (1, Kfc)       f32   FC bias
    out_ref   : (1, 1, Kfc)    f32   logits for this image
    """
    # Conv as ONE MXU matmul: all 9 taps folded into the contraction dim.
    feats = jnp.dot(x_ref[0], wc_ref[...],
                    preferred_element_type=jnp.float32)            # (HWpad, Cpad)
    feats = jnp.maximum(feats + bc_ref[...], 0.0)                  # bias + ReLU

    # Global-average-pool as an MXU matvec.  The mask row zeroes the
    # sublane-padding rows (which otherwise carry relu(bias)).
    pooled = jnp.dot(poolw_ref[...], feats.astype(jnp.bfloat16),
                     preferred_element_type=jnp.float32) * inv_hw  # (1, Cpad)

    # FC head (bf16 operands, f32 accumulate, f32 bias epilogue).
    logits = jnp.dot(pooled.astype(jnp.bfloat16), wf_ref[...],
                     preferred_element_type=jnp.float32) + bf_ref[...]
    out_ref[...] = logits.reshape(out_ref.shape)


def model_wrapper_forward(x_nchw, conv_w, conv_b, fc_w, fc_b):
    """x_nchw: (N, Cin, H, W) f32. Returns logits (N, num_classes) f32."""
    N, Cin, H, W = x_nchw.shape
    Cout = conv_w.shape[0]
    num_classes = fc_w.shape[0]

    HW = H * W
    HWpad = _round_up(HW, 8)                 # sublane-aligned spatial rows
    Kc = _round_up(9 * Cin, 128)             # lane-dense contraction dim
    Cpad = _round_up(Cout, 128)              # lane-dense conv output channels
    Kfc = _round_up(num_classes, 128)        # lane-dense logits

    # --- host glue -----------------------------------------------------------
    # NCHW -> NHWC, SAME zero pad, im2col with (tap-major, channel-fastest) order.
    x_nhwc = jnp.transpose(x_nchw, (0, 2, 3, 1))
    xp = jnp.pad(x_nhwc, ((0, 0), (1, 1), (1, 1), (0, 0)))          # (N,H+2,W+2,Cin)
    taps = [xp[:, dh:dh + H, dw:dw + W, :]
            for dh in range(3) for dw in range(3)]
    xcol = jnp.concatenate(taps, axis=-1).reshape(N, HW, 9 * Cin)
    xcol = jnp.pad(xcol, ((0, 0), (0, HWpad - HW), (0, Kc - 9 * Cin)))
    xcol = xcol.astype(jnp.bfloat16)                                # (N,HWpad,Kc)

    # conv weight (Cout, Cin, 3, 3) -> (9*Cin, Cout), same tap order as im2col.
    wc = jnp.transpose(conv_w, (2, 3, 1, 0)).reshape(9 * Cin, Cout)
    wc = jnp.pad(wc, ((0, Kc - 9 * Cin), (0, Cpad - Cout))).astype(jnp.bfloat16)
    bc = jnp.pad(conv_b, (0, Cpad - Cout)).reshape(1, Cpad).astype(jnp.float32)

    # pooling mask row: 1.0 on valid spatial positions, 0.0 on sublane padding.
    poolw = (jnp.arange(HWpad) < HW).astype(jnp.bfloat16).reshape(1, HWpad)

    # FC head, padded lane-dense, bf16 operands.
    wf = jnp.pad(fc_w.T, ((0, Cpad - Cout), (0, Kfc - num_classes)))
    wf = wf.astype(jnp.bfloat16)                                    # (Cpad, Kfc)
    bf = jnp.pad(fc_b, (0, Kfc - num_classes)).reshape(1, Kfc).astype(jnp.float32)

    kernel = functools.partial(classifier_kernel, inv_hw=1.0 / float(HW))

    # VMEM budget from actual (sublane/lane padded, double-buffered) blocks.
    def blk_bytes(shape, itemsize):
        r = list(shape)
        if len(r) >= 2:
            r[-2] = _round_up(r[-2], 8)
        r[-1] = _round_up(r[-1], 128)
        n = 1
        for d in r:
            n *= d
        return n * itemsize

    vmem = 2 * (blk_bytes((1, HWpad, Kc), 2) + blk_bytes((Kc, Cpad), 2)
                + blk_bytes((1, Cpad), 4) + blk_bytes((1, HWpad), 2)
                + blk_bytes((Cpad, Kfc), 2) + blk_bytes((1, Kfc), 4)
                + blk_bytes((1, 1, Kfc), 4)) + (2 << 20)
    vmem = min(max(vmem, 8 << 20), 64 << 20)     # stay under v7x physical VMEM

    out = pl.pallas_call(
        kernel,
        out_shape=jax.ShapeDtypeStruct((N, 1, Kfc), jnp.float32),
        grid_spec=pltpu.PrefetchScalarGridSpec(
            num_scalar_prefetch=0,
            grid=(N,),
            in_specs=[
                pl.BlockSpec((1, HWpad, Kc), lambda n: (n, 0, 0)),
                pl.BlockSpec((Kc, Cpad), lambda n: (0, 0)),
                pl.BlockSpec((1, Cpad), lambda n: (0, 0)),
                pl.BlockSpec((1, HWpad), lambda n: (0, 0)),
                pl.BlockSpec((Cpad, Kfc), lambda n: (0, 0)),
                pl.BlockSpec((1, Kfc), lambda n: (0, 0)),
            ],
            out_specs=pl.BlockSpec((1, 1, Kfc), lambda n: (n, 0, 0)),
        ),
        compiler_params=pltpu.CompilerParams(
            dimension_semantics=("parallel",),
            vmem_limit_bytes=vmem),
    )(xcol, wc, bc, poolw, wf, bf)

    return out[:, 0, :num_classes]


def reference_forward(x_nchw, conv_w, conv_b, fc_w, fc_b):
    """Pure-JAX f32 reference (same math as PyTorch conv->relu->gap->linear)."""
    x_nhwc = jnp.transpose(x_nchw, (0, 2, 3, 1))
    w_hwio = jnp.transpose(conv_w, (2, 3, 1, 0))
    y = jax.lax.conv_general_dilated(
        x_nhwc, w_hwio, window_strides=(1, 1), padding="SAME",
        dimension_numbers=("NHWC", "HWIO", "NHWC"))
    y = jax.nn.relu(y + conv_b[None, None, None, :])
    pooled = jnp.mean(y, axis=(1, 2))
    return pooled @ fc_w.T + fc_b[None, :]


if __name__ == "__main__":
    # Small shapes consistent with an image-classifier forward.
    N, Cin, H, W = 2, 4, 16, 16
    Cmid, num_classes = 32, 10

    key = jax.random.PRNGKey(0)
    kx, kw1, kb1, kw2, kb2 = jax.random.split(key, 5)

    x = jax.random.normal(kx, (N, Cin, H, W), dtype=jnp.float32)
    conv_w = jax.random.normal(kw1, (Cmid, Cin, 3, 3), dtype=jnp.float32) * 0.1
    conv_b = jax.random.normal(kb1, (Cmid,), dtype=jnp.float32) * 0.1
    fc_w = jax.random.normal(kw2, (num_classes, Cmid), dtype=jnp.float32) * 0.1
    fc_b = jax.random.normal(kb2, (num_classes,), dtype=jnp.float32) * 0.1

    logits = model_wrapper_forward(x, conv_w, conv_b, fc_w, fc_b)
    logits = jax.block_until_ready(logits)

    ref = reference_forward(x, conv_w, conv_b, fc_w, fc_b)
    assert logits.shape == (N, num_classes)
    # Conv/pool/FC use bf16 MXU operands (f32 accumulation) -> bf16-level
    # tolerance vs. the pure-f32 reference.
    assert jnp.allclose(logits, ref, atol=3e-2, rtol=3e-2), (
        float(jnp.max(jnp.abs(logits - ref))))

    # TODO(synk): dropout (conf.dropout_rate) is inference-time identity; not emitted.
    print("KERNEL_OK")
</pallas_src>

<mosaic_0001>
module attributes {stable_mosaic.version = 11 : i64} {
  func.func @classifier_kernel(%arg0: i32, %arg1: memref<1x256x128xbf16, #tpu.memory_space<vmem>>, %arg2: memref<128x128xbf16, #tpu.memory_space<vmem>>, %arg3: memref<1x128xf32, #tpu.memory_space<vmem>>, %arg4: memref<1x256xbf16, #tpu.memory_space<vmem>>, %arg5: memref<128x128xbf16, #tpu.memory_space<vmem>>, %arg6: memref<1x128xf32, #tpu.memory_space<vmem>>, %arg7: memref<1x1x128xf32, #tpu.memory_space<vmem>>) attributes {dimension_semantics = [#tpu.dimension_semantics<parallel>], iteration_bounds = array<i64: 2>, scalar_prefetch = 0 : i64, scratch_operands = 0 : i64, tpu.core_type = #tpu.core_type<tc>, window_params = [{transform_indices = @transform_0, window_bounds = array<i64: 1, 256, 128>}, {pipeline_mode = #tpu.pipeline_mode<synchronous>, transform_indices = @transform_1, window_bounds = array<i64: 128, 128>}, {pipeline_mode = #tpu.pipeline_mode<synchronous>, transform_indices = @transform_2, window_bounds = array<i64: 1, 128>}, {pipeline_mode = #tpu.pipeline_mode<synchronous>, transform_indices = @transform_3, window_bounds = array<i64: 1, 256>}, {pipeline_mode = #tpu.pipeline_mode<synchronous>, transform_indices = @transform_4, window_bounds = array<i64: 128, 128>}, {pipeline_mode = #tpu.pipeline_mode<synchronous>, transform_indices = @transform_5, window_bounds = array<i64: 1, 128>}, {transform_indices = @transform_6, window_bounds = array<i64: 1, 1, 128>}]} {
    %c0 = arith.constant 0 : index
    %c0_0 = arith.constant 0 : index
    %c0_1 = arith.constant 0 : index
    %0 = vector.load %arg1[%c0, %c0_0, %c0_1] : memref<1x256x128xbf16, #tpu.memory_space<vmem>>, vector<1x256x128xbf16>
    %1 = vector.shape_cast %0 : vector<1x256x128xbf16> to vector<256x128xbf16>
    %c0_2 = arith.constant 0 : index
    %c0_3 = arith.constant 0 : index
    %2 = vector.load %arg2[%c0_2, %c0_3] : memref<128x128xbf16, #tpu.memory_space<vmem>>, vector<128x128xbf16>
    %cst = arith.constant dense<0.000000e+00> : vector<256x128xf32>
    %3 = tpu.matmul %1, %2, %cst {dimension_numbers = #tpu.dot_dimension_numbers<[1], [0], [0], [1], [0, 0, 1, 1], [], []>} : vector<256x128xbf16>, vector<128x128xbf16>, vector<256x128xf32> -> vector<256x128xf32>
    %c0_4 = arith.constant 0 : index
    %c0_5 = arith.constant 0 : index
    %4 = vector.load %arg3[%c0_4, %c0_5] : memref<1x128xf32, #tpu.memory_space<vmem>>, vector<1x128xf32>
    %5 = vector.broadcast %4 : vector<1x128xf32> to vector<256x128xf32>
    %6 = arith.addf %3, %5 : vector<256x128xf32>
    %cst_6 = arith.constant 0.000000e+00 : f32
    %7 = vector.broadcast %cst_6 : f32 to vector<256x128xf32>
    %8 = arith.maximumf %6, %7 : vector<256x128xf32>
    %c0_7 = arith.constant 0 : index
    %c0_8 = arith.constant 0 : index
    %9 = vector.load %arg4[%c0_7, %c0_8] : memref<1x256xbf16, #tpu.memory_space<vmem>>, vector<1x256xbf16>
    %10 = arith.truncf %8 : vector<256x128xf32> to vector<256x128xbf16>
    %cst_9 = arith.constant dense<0.000000e+00> : vector<1x128xf32>
    %11 = tpu.matmul %9, %10, %cst_9 {dimension_numbers = #tpu.dot_dimension_numbers<[1], [0], [0], [1], [0, 0, 1, 1], [], []>} : vector<1x256xbf16>, vector<256x128xbf16>, vector<1x128xf32> -> vector<1x128xf32>
    %cst_10 = arith.constant 3.906250e-03 : f32
    %12 = vector.broadcast %cst_10 : f32 to vector<1x128xf32>
    %13 = arith.mulf %11, %12 : vector<1x128xf32>
    %14 = arith.truncf %13 : vector<1x128xf32> to vector<1x128xbf16>
    %c0_11 = arith.constant 0 : index
    %c0_12 = arith.constant 0 : index
    %15 = vector.load %arg5[%c0_11, %c0_12] : memref<128x128xbf16, #tpu.memory_space<vmem>>, vector<128x128xbf16>
    %cst_13 = arith.constant dense<0.000000e+00> : vector<1x128xf32>
    %16 = tpu.matmul %14, %15, %cst_13 {dimension_numbers = #tpu.dot_dimension_numbers<[1], [0], [0], [1], [0, 0, 1, 1], [], []>} : vector<1x128xbf16>, vector<128x128xbf16>, vector<1x128xf32> -> vector<1x128xf32>
    %c0_14 = arith.constant 0 : index
    %c0_15 = arith.constant 0 : index
    %17 = vector.load %arg6[%c0_14, %c0_15] : memref<1x128xf32, #tpu.memory_space<vmem>>, vector<1x128xf32>
    %18 = arith.addf %16, %17 : vector<1x128xf32>
    %19 = vector.shape_cast %18 : vector<1x128xf32> to vector<1x1x128xf32>
    %c0_16 = arith.constant 0 : index
    %c0_17 = arith.constant 0 : index
    %c0_18 = arith.constant 0 : index
    %20 = vector.load %arg7[%c0_16, %c0_17, %c0_18] : memref<1x1x128xf32, #tpu.memory_space<vmem>>, vector<1x1x128xf32>
    tpu.vector_store %arg7[%c0_16, %c0_17, %c0_18], %19 {strides = array<i32>} : memref<1x1x128xf32, #tpu.memory_space<vmem>>, vector<1x1x128xf32>,
    return
  }
  func.func @transform_0(%arg0: i32) -> (i32, i32, i32) {
    %c0_i32 = arith.constant 0 : i32
    %c0_i32_0 = arith.constant 0 : i32
    %c0_i32_1 = arith.constant 0 : i32
    return %arg0, %c0_i32, %c0_i32_0 : i32, i32, i32
  }
  func.func @transform_1(%arg0: i32) -> (i32, i32) {
    %c0_i32 = arith.constant 0 : i32
    %c0_i32_0 = arith.constant 0 : i32
    %c0_i32_1 = arith.constant 0 : i32
    return %c0_i32, %c0_i32_0 : i32, i32
  }
  func.func @transform_2(%arg0: i32) -> (i32, i32) {
    %c0_i32 = arith.constant 0 : i32
    %c0_i32_0 = arith.constant 0 : i32
    %c0_i32_1 = arith.constant 0 : i32
    return %c0_i32, %c0_i32_0 : i32, i32
  }
  func.func @transform_3(%arg0: i32) -> (i32, i32) {
    %c0_i32 = arith.constant 0 : i32
    %c0_i32_0 = arith.constant 0 : i32
    %c0_i32_1 = arith.constant 0 : i32
    return %c0_i32, %c0_i32_0 : i32, i32
  }
  func.func @transform_4(%arg0: i32) -> (i32, i32) {
    %c0_i32 = arith.constant 0 : i32
    %c0_i32_0 = arith.constant 0 : i32
    %c0_i32_1 = arith.constant 0 : i32
    return %c0_i32, %c0_i32_0 : i32, i32
  }
  func.func @transform_5(%arg0: i32) -> (i32, i32) {
    %c0_i32 = arith.constant 0 : i32
    %c0_i32_0 = arith.constant 0 : i32
    %c0_i32_1 = arith.constant 0 : i32
    return %c0_i32, %c0_i32_0 : i32, i32
  }
  func.func @transform_6(%arg0: i32) -> (i32, i32, i32) {
    %c0_i32 = arith.constant 0 : i32
    %c0_i32_0 = arith.constant 0 : i32
    %c0_i32_1 = arith.constant 0 : i32
    return %arg0, %c0_i32, %c0_i32_0 : i32, i32, i32
  }
}

</mosaic_0001>

<bundles_post_ra>
// kernel: tpu_custom_call.1
= control target key start
LH: loop header
LB: loop body
LE: loop exit
PB: predicated region body
PF: predicated region fallthrough
CT: control target
= control target key end

     0   :  { %11 = vsyncpa [#allocation3], 0  ;;  %s1797_s0 = inlined_call_operand.hbm [shape: bf16[2,256,128], index: 0, kind: input, shape index: {}]   ;;  %s1798_s1 = inlined_call_operand.hbm [shape: bf16[128,128], index: 1, kind: input, shape index: {}]   ;;  %s1799_s2 = inlined_call_operand.vmem [shape: f32[1,128], index: 2, kind: input, shape index: {}]   ;;  %s1800_s3 = inlined_call_operand.vmem [shape: bf16[1,256], index: 3, kind: input, shape index: {}]   ;;  %s1801_s4 = inlined_call_operand.hbm [shape: bf16[128,128], index: 4, kind: input, shape index: {}]   ;;  %s1802_s5 = inlined_call_operand.vmem [shape: f32[1,128], index: 5, kind: input, shape index: {}]   ;;  %s1803_s6 = inlined_call_operand.hbm [shape: f32[2,1,128], index: 6, kind: output, shape index: {}]  }
   0x1   :  { %13 = vsyncpa [#allocation3 + $0x1], 0 }
   0x2   :  { %14 = vsyncpa [#allocation6], 0 }
   0x3   :  { %15 = vsyncpa [#allocation4], 0 }
   0x4   :  { %17 = vsyncpa [#allocation4 + $0x1], 0  ;;  %s1458_s21 = smov 0   ;;  %s1460_s22 = smov 0  }
   0x5   :  { %s1462_s23 = smov 0   ;;  %s1464_s24 = smov 0  }
   0x6 LB: > { %s1479_s25 = sadd.s32 4294967295, %s1412_s24   ;;  %s979_s26 = sadd.s32 4294967294, %s1412_s24   ;;  %s1412_s24 = sphi %s1464_s24, %s1823_s24   ;;  %s1408_s23 = sphi %s1462_s23, %s1822_s23   ;;  %s1404_s22 = sphi %s1460_s22, %s1821_s22   ;;  %s1400_s21 = sphi %s1458_s21, %s1820_s21  }
   0x7   : > { %p43_p0 = scmp.ne.s32.totalorder %s1404_s22, %s1400_s21  ;;  %p1804_p1 = scmp.eq.s32.totalorder %s1479_s25, 0 }
   0x8   : > { %p178_p3 = scmp.eq.s32.totalorder %s979_s26, 1  ;;  %p980_p5 = scmp.ge.s32.totalorder %s1412_s24, 1 }
   0x9   : > { %p1488_p4 = por %p1804_p1, %p43_p0  ;;  %p185_p7 = scmp.lt.s32.totalorder %s1412_s24, 3 }
   0xa   : > { %p1493_p6 = por %p178_p3, %p43_p0  ;;  %s1414_s30 = smov [#allocation5]  }
   0xb   : > { %s1807_s27 = scalar_select %p1488_p4, 1, 0 }
   0xc   : > { %s1808_s28 = scalar_select %p1493_p6, 1, 0 }
   0xd   : > { %p1498_p8 = pnand %p980_p5, %p185_p7  ;;  %s197_s7 = sshll.u32 %s1414_s30, 4  ;;  %s1502_s7 = int_to_ptr.vmem [resolvable:$true] %s197_s7 }
   0xe   : > { %s1415_s9 = smov [#allocation7]   ;;  %s1256_s13 = scalar_lea.hbm %s1798_s1, 1024 }
   0xf   : > { %p1164_p9 = pneg %p1498_p8  ;;  %s216_s10 = sshll.u32 %s1415_s9, 4  ;;  %s1513_s10 = int_to_ptr.vmem [resolvable:$true] %s216_s10 }
  0x10   : > { %p1257_p12 = scmp.ne.s32.totalorder %s1798_s1, %s1256_s13  ;;  %p1263_p5 = scmp.lt.u32.totalorder %s1256_s13, %s1798_s1 }
  0x11   : > { %p1509_p11 = pnand %p1164_p9, %p1804_p1 }
  0x13   : > { %p1258_p13 = pneg %p1509_p11 }
  0x15   : > { %p1259_p0 = pnand %p1258_p13, %p1257_p12 }
  0x17   : > { %p1260_p3 = pneg %p1259_p0 }
  0x19   : > { %p1265_p7 = pnand %p1263_p5, %p1260_p3 }
  0x1b   : > { %1268 = shalt.err (!%p1265_p7)
}
  0x1c   : > { %s1269_s18 = scalar_lea.vmem %s1502_s7, 1024  ;;  %p1277_p2 = scmp.lt.s32.totalorder %s1502_s7, %s1502_s7 }
  0x1d   : > { %p1270_p9 = scmp.ne.s32.totalorder %s1502_s7, %s1269_s18  ;;  %p1278_p12 = scmp.lt.s32.totalorder %s1269_s18, %s1269_s18 }
  0x1f   : > { %p1272_p10 = pnand %p1270_p9, %p1258_p13  ;;  %p1279_p0 = por %p1278_p12, %p1277_p2 }
  0x21   : > { %p1273_p1 = pneg %p1272_p10 }
  0x23   : > { %p1280_p6 = pnand %p1279_p0, %p1273_p1 }
  0x25   : > { %1283 = shalt.err (!%p1280_p6)
}
  0x26   : > { %s1416_s19 = smov 64   ;;  %s1417_s20 = smov 4  }
  0x27   : > { %1167 = dma.hbm_to_vmem [thread:$0]  (!%p1509_p11), %s1798_s1, 1024, %s1502_s7, [#allocation6], %s1416_s19, %s1416_s19, %s1417_s20  }
  0x28   : > { %s1284_s12 = scalar_lea.hbm %s1801_s4, 1024 }
  0x29   : > { %p1285_p1 = scmp.ne.s32.totalorder %s1801_s4, %s1284_s12  ;;  %p1291_p10 = scmp.lt.u32.totalorder %s1284_s12, %s1801_s4 }
  0x2b   : > { %p1287_p2 = pnand %p1285_p1, %p1258_p13 }
  0x2d   : > { %p1288_p6 = pneg %p1287_p2 }
  0x2f   : > { %p1293_p3 = pnand %p1291_p10, %p1288_p6 }
  0x31   : > { %1296 = shalt.err (!%p1293_p3)
}
  0x32   : > { %s1297_s7 = scalar_lea.vmem %s1513_s10, 1024  ;;  %p1305_p12 = scmp.lt.s32.totalorder %s1513_s10, %s1513_s10 }
  0x33   : > { %p1298_p5 = scmp.ne.s32.totalorder %s1513_s10, %s1297_s7  ;;  %p1306_p0 = scmp.lt.s32.totalorder %s1297_s7, %s1297_s7 }
  0x35   : > { %p1300_p7 = pnand %p1298_p5, %p1258_p13  ;;  %p1307_p1 = por %p1306_p0, %p1305_p12 }
  0x37   : > { %p1301_p9 = pneg %p1300_p7 }
  0x39   : > { %p1308_p2 = pnand %p1307_p1, %p1301_p9 }
  0x3b   : > { %1311 = shalt.err (!%p1308_p2)
}
  0x3c   : > { %1170 = dma.hbm_to_vmem [thread:$0]  (!%p1509_p11), %s1801_s4, 1024, %s1513_s10, [#allocation6], %s1416_s19, %s1416_s19, %s1417_s20  }
  0x3d   : > { %s1574_s8 = sadd.s32 1, %s1412_s24   ;;  %s30_s26 = sadd.s32 1, %s1408_s23 }
  0x3e   : > { %s27_s30 = ssub.s32 %s1412_s24, %s1574_s8  ;;  %p37_p13 = scmp.ne.s32.totalorder %s1408_s23, %s1404_s22 }
  0x3f   : > { %p28_p6 = scmp.eq.s32.totalorder %s27_s30, 0  ;;  %p38_p10 = scmp.eq.s32.totalorder %s1412_s24, 0 }
  0x40   : > { %p1811_p3 = scmp.eq.s32.totalorder %s1479_s25, 1  ;;  %p1181_p7 = scmp.lt.s32.totalorder %s1412_s24, 2 }
  0x41   : > { %s1590_s11 = scalar_select %p28_p6, %s1408_s23, %s30_s26  }
  0x42   : > { %p1584_p5 = por %p1811_p3, %p37_p13  ;;  %p39_p9 = por %p38_p10, %p37_p13 }
  0x43   : > { %s233_s12 = sand.u32 1, %s1408_s23   ;;  %s1028_s10 = sshll.u32 %s1412_s24, 11 }
  0x44   : > { %s1812_s9 = scalar_select %p1584_p5, 1, 0 }
  0x45   : > { %s984_s13 = sshll.u32 %s233_s12, 7  ;;  %s1597_s16 = scalar_lea.hbm %s1797_s0, %s1028_s10 }
  0x46   : > { %s237_s7 = scalar_lea.vmem [#allocation2], %s984_s13  ;;  %p1601_p11 = pnand %p1181_p7, %p39_p9 }
  0x47   : > { %s244_s17 = sshll.u32 %s237_s7, 4  ;;  %s1605_s26 = scalar_lea.sflag [#allocation3], %s233_s12  ;;  %s1599_s17 = int_to_ptr.vmem [resolvable:$true] %s244_s17 }
  0x48   : > { %s1312_s30 = scalar_lea.hbm %s1597_s16, 2048  ;;  %p1314_p0 = pneg %p1601_p11 }
  0x49   : > { %p1313_p12 = scmp.ne.s32.totalorder %s1597_s16, %s1312_s30  ;;  %s1317_s14 = scalar_lea.hbm %s1797_s0, 4096 }
  0x4a   : > { %p1318_p13 = scmp.lt.u32.totalorder %s1597_s16, %s1797_s0  ;;  %p1319_p6 = scmp.lt.u32.totalorder %s1317_s14, %s1312_s30 }
  0x4b   : > { %p1315_p1 = pnand %p1314_p0, %p1313_p12  ;;  %p1321_p3 = scmp.lt.u32.totalorder %s1312_s30, %s1597_s16 }
  0x4c   : > { %p1320_p10 = por %p1319_p6, %p1318_p13 }
  0x4d   : > { %p1316_p2 = pneg %p1315_p1 }
  0x4e   : > { %p1322_p7 = por %p1321_p3, %p1320_p10 }
  0x50   : > { %p1323_p9 = pnand %p1322_p7, %p1316_p2 }
  0x52   : > { %1326 = shalt.err (!%p1323_p9)
}
  0x53   : > { %s1327_s12 = scalar_lea.vmem %s1599_s17, 2048  ;;  %s1418_s13 = smov [#allocation2]  }
  0x54   : > { %p1328_p12 = scmp.ne.s32.totalorder %s1599_s17, %s1327_s12  ;;  %s1332_s10 = sshll.u32 %s1418_s13, 4  ;;  %s1333_s10 = int_to_ptr.vmem [resolvable:$false] %s1332_s10 }
  0x55   : > { %s1334_s15 = scalar_lea.vmem %s1333_s10, 4096  ;;  %p1335_p4 = scmp.lt.s32.totalorder %s1599_s17, %s1333_s10 }
  0x56   : > { %p1330_p1 = pnand %p1328_p12, %p1314_p0  ;;  %p1336_p13 = scmp.lt.s32.totalorder %s1334_s15, %s1327_s12 }
  0x58   : > { %p1331_p5 = pneg %p1330_p1  ;;  %p1337_p6 = por %p1336_p13, %p1335_p4 }
  0x5a   : > { %p1338_p10 = pnand %p1337_p6, %p1331_p5 }
  0x5c   : > { %1341 = shalt.err (!%p1338_p10)
}
  0x5d   : > { %1174 = dma.hbm_to_vmem [thread:$0]  (!%p1601_p11), %s1597_s16, 2048, %s1599_s17, %s1605_s26, %s1416_s19, %s1416_s19, %s1417_s20  }
  0x5e   : > { %256 = sbr.rel (%p1498_p8) target bundleno = 870 (0x366), region = 44  ;;  %s1639_s30 = sand.u32 (!%p1498_p8), 1, %s1404_s22  }
  0x5f   : > { %s988_s14 = sshll.u32 (!%p1498_p8), %s1639_s30, 7  ;;  %s259_s7 = scalar_lea.sflag (!%p1498_p8), [#allocation3], %s1639_s30 }
  0x60   : > { %s1643_s12 = scalar_lea.vmem (!%p1498_p8), [#allocation2], %s988_s14  ;;  %p1814_p4 = scmp.ne.s32.totalorder (!%p1498_p8), %s1807_s27, 0 }
  0x65   : > { %1387 = dma.done.wait (%p1814_p4), %s259_s7, 2048  }
  0x66   : > { %1389 = vsyncadd (%p1814_p4), %s259_s7, 4294965248  ;;  %p1815_p5 = scmp.eq.s32.totalorder %s1479_s25, 0 }
  0x68   : > { %1391 = dma.done.wait (%p1815_p5), [#allocation6], 2048   ;;  %p1816_p8 = pmov %p1815_p5 }
  0x69   : > { %v1224_v0 = vld [vmem:[#allocation5] sm:$0xff]   ;;  %v1225_v1 = vld [vmem:[#allocation5 + $0x8] sm:$0xff]   ;;  %v1226_v2 = vld [vmem:[#allocation5 + $0x10] sm:$0xff]   ;;  %v1419_v24 = vmov 1966171168   ;;  %v720_v26 = vlaneseq  ;;  %vm1421_vm0 = vmmov 0  }
  0x6a   : > { %1393 = vsyncadd (%p1816_p8), [#allocation6], 4294965248  ;;  %1084 = vmatprep.subr.bf16.mxu0 %v1224_v0  ;;  %v1227_v3 = vld [vmem:[#allocation5 + $0x18] sm:$0xff]   ;;  %v1232_v4 = vld [vmem:[%s1643_s12] sm:$0xff]   ;;  %v718_v25 = vunpack.c.l.s4 %v1419_v24  ;;  %s1025_s18 = sshll.u32 %s1479_s25, 4  ;;  %s297_s26 = scalar_lea.vmem [#allocation8], %s1639_s30 }
  0x6b   : > { %1085 = vmatpush3.bf16.msra.mxu0 %v1224_v0  ;;  %1100 = vmatprep.mubr.bf16.mxu0 %v1232_v4  ;;  %v1228_v5 = vld [vmem:[#allocation5 + $0x20] sm:$0xff]   ;;  %v1229_v6 = vld [vmem:[#allocation5 + $0x28] sm:$0xff]   ;;  %v1230_v7 = vld [vmem:[#allocation5 + $0x30] sm:$0xff]   ;;  %v721_v28 = vshrl.u32 %v720_v26, 7  ;;  %s894_s13 = sshll.u32 %s297_s26, 4  ;;  %s1753_s14 = scalar_lea.hbm %s1803_s6, %s1025_s18  ;;  %s1755_s13 = int_to_ptr.vmem [resolvable:$true] %s894_s13 }
  0x6c   : > { %1086 = vmatprep.subr.bf16.mxu0 %v1225_v1  ;;  %v1231_v8 = vld [vmem:[#allocation5 + $0x38] sm:$0xff]   ;;  %v1233_v9 = vld [vmem:[%s1643_s12 + $0x8] sm:$0xff]   ;;  %v1234_v10 = vld [vmem:[%s1643_s12 + $0x10] sm:$0xff]   ;;  %v719_v27 = vunpack.c.0.s8 %v718_v25  ;;  %s882_s7 = scalar_lea.sflag [#allocation4], %s1639_s30  ;;  %s1342_s25 = scalar_lea.vmem %s1755_s13, 16 }
  0x6d   : > { %v1235_v11 = vld [vmem:[%s1643_s12 + $0x18] sm:$0xff]   ;;  %v1236_v12 = vld [vmem:[%s1643_s12 + $0x20] sm:$0xff]   ;;  %v1237_v13 = vld [vmem:[%s1643_s12 + $0x28] sm:$0xff]   ;;  %p1343_p11 = scmp.ne.s32.totalorder %s1755_s13, %s1342_s25  ;;  %p1817_p0 = scmp.ne.s32.totalorder %s1812_s9, 0 }
  0x6e   : > { %v1238_v14 = vld [vmem:[%s1643_s12 + $0x30] sm:$0xff]   ;;  %v1239_v15 = vld [vmem:[%s1643_s12 + $0x38] sm:$0xff]   ;;  %v1240_v16 = vld [vmem:[%s1643_s12 + $0x40] sm:$0xff]   ;;  %v1676_v31 = vsub.s32 %v719_v27, %v721_v28 }
  0x6f   : > { %1087 = vmatpush3.bf16.msra.mxu0 %v1225_v1  ;;  %v1241_v17 = vld [vmem:[%s1643_s12 + $0x48] sm:$0xff]   ;;  %v1242_v18 = vld [vmem:[%s1643_s12 + $0x50] sm:$0xff]   ;;  %v1243_v19 = vld [vmem:[%s1643_s12 + $0x58] sm:$0xff]   ;;  %p1344_p2 = pnand %p1343_p11, %p1817_p0 }
  0x70   : > { %1088 = vmatprep.subr.bf16.mxu0 %v1226_v2  ;;  %v1244_v20 = vld [vmem:[%s1643_s12 + $0x60] sm:$0xff]   ;;  %v1245_v21 = vld [vmem:[%s1643_s12 + $0x68] sm:$0xff]   ;;  %v1246_v22 = vld [vmem:[%s1643_s12 + $0x70] sm:$0xff]  }
  0x71   : > { %v1247_v23 = vld [vmem:[%s1643_s12 + $0x78] sm:$0xff]   ;;  %v1672_v29 = vld.sshfl [vmem:[%s1800_s3] sm:$0x11 pattern:$0x75316420]  ;;  %p1345_p3 = pneg %p1344_p2  ;;  %s1422_s12 = smov [#allocation8]  }
  0x72   : > { %v716_v30 = vcombine.high %v1672_v29, %v1672_v29  ;;  %v723_v33 = vrot.slane %v1672_v29, %v1676_v31  ;;  %v1684_v34 = vld [vmem:[%s1799_s2] ss:$0 sm:$0xff]  ;;  %v1255_v29 = vld [vmem:[#allocation7 + $0x38] sm:$0xff]   ;;  %s1346_s27 = sshll.u32 %s1422_s12, 4  ;;  %s1347_s27 = int_to_ptr.vmem [resolvable:$false] %s1346_s27 }
  0x73   : > { %1089 = vmatpush3.bf16.msra.mxu0 %v1226_v2  ;;  %s1348_s29 = scalar_lea.vmem %s1347_s27, 32  ;;  %p1349_p7 = scmp.lt.s32.totalorder %s1755_s13, %s1347_s27 }
  0x74   : > { %1090 = vmatprep.subr.bf16.mxu0 %v1227_v3  ;;  %v730_v32 = vrot.slane %v716_v30, %v1676_v31  ;;  %p1350_p9 = scmp.lt.s32.totalorder %s1348_s29, %s1342_s25 }
  0x76   : > { %765 = vmatprep.mubr.bf16.mxu1 %v730_v32  ;;  %p1351_p12 = por %p1350_p9, %p1349_p7 }
  0x77   : > { %1091 = vmatpush3.bf16.msra.mxu0 %v1227_v3 }
  0x78   : > { %1092 = vmatprep.subr.bf16.mxu0 %v1228_v5  ;;  %p1352_p1 = pnand %p1351_p12, %p1345_p3 }
  0x7b   : > { %1093 = vmatpush3.bf16.msra.mxu0 %v1228_v5 }
  0x7c   : > { %1094 = vmatprep.subr.bf16.mxu0 %v1229_v6 }
  0x7f   : > { %1095 = vmatpush3.bf16.msra.mxu0 %v1229_v6 }
  0x80   : > { %1096 = vmatprep.subr.bf16.mxu0 %v1230_v7 }
  0x83   : > { %1097 = vmatpush3.bf16.msra.mxu0 %v1230_v7 }
  0x84   : > { %1098 = vmatprep.subr.bf16.mxu0 %v1231_v8 }
  0x87   : > { %1099 = vmatpush3.bf16.msra.mxu0 %v1231_v8 }
  0x8a   : > { %1101 = vmatmul.mubr.bf16.vlgmr.msra.gmra.mrb[0].mxu0 %v1233_v9 }
  0x8b   : > { %1104 = vmatprep.mubr.bf16.mxu0 %v1234_v10 }
  0x92   : > { %1105 = vmatmul.mubr.bf16.gmra.mrb[4].mxu0 %v1235_v11 }
  0x93   : > { %1108 = vmatprep.mubr.bf16.mxu0 %v1236_v12 }
  0x9a   : > { %1109 = vmatmul.mubr.bf16.gmra.mrb[8].mxu0 %v1237_v13 }
  0x9b   : > { %1112 = vmatprep.mubr.bf16.mxu0 %v1238_v14 }
  0xa2   : > { %1113 = vmatmul.mubr.bf16.gmra.mrb[12].mxu0 %v1239_v15 }
  0xa3   : > { %1116 = vmatprep.mubr.bf16.mxu0 %v1240_v16 }
  0xaa   : > { %1117 = vmatmul.mubr.bf16.gmra.mrb[16].mxu0 %v1241_v17 }
  0xab   : > { %1120 = vmatprep.mubr.bf16.mxu0 %v1242_v18 }
  0xb2   : > { %1121 = vmatmul.mubr.bf16.gmra.mrb[20].mxu0 %v1243_v19 }
  0xb3   : > { %1124 = vmatprep.mubr.bf16.mxu0 %v1244_v20 }
  0xba   : > { %1125 = vmatmul.mubr.bf16.gmra.mrb[24].mxu0 %v1245_v21 }
  0xbb   : > { %1128 = vmatprep.mubr.bf16.mxu0 %v1246_v22 }
  0xc2   : > { %1129 = vmatmul.mubr.bf16.gmra.mrb[28].mxu0 %v1247_v23 }
 0x15d   : > { %v1102_v35 = vpop.f32.mrb[0].mxu0 }
 0x15e   : > { %v541_v36 = vadd.f32 %v1102_v35, %v1684_v34  ;;  %v532_v37 = vpop.f32.mrb[1].mxu0 }
 0x15f   : > { %v533_v38 = vadd.f32 %v1684_v34, %v532_v37  ;;  %v1103_v39 = vpop.f32.mrb[2].mxu0 }
 0x160   : > { %v544_v40 = vadd.f32 %v1103_v39, %v1684_v34  ;;  %v535_v41 = vpop.f32.mrb[3].mxu0  ;;  %v661_v43 = vmax.f32 %v541_v36, 0.0 }
 0x161   : > { %v536_v42 = vadd.f32 %v1684_v34, %v535_v41  ;;  %v659_v45 = vmax.f32 %v533_v38, 0.0 }
 0x162   : > { %v662_v44 = vmax.f32 %v544_v40, 0.0 }
 0x163   : > { %v660_v46 = vmax.f32 %v536_v42, 0.0 }
 0x164   : > { %v1690_v47 = vpack.c.bf16 %v662_v44, %v661_v43 }
 0x165   : > { %v1106_v48 = vpop.f32.mrb[4].mxu0  ;;  %v1692_v49 = vpack.c.bf16 %v660_v46, %v659_v45 }
 0x166   : > { %v557_v50 = vadd.f32 %v1106_v48, %v1684_v34  ;;  %v548_v51 = vpop.f32.mrb[5].mxu0 }
 0x167   : > { %v549_v52 = vadd.f32 %v1684_v34, %v548_v51  ;;  %v1107_v53 = vpop.f32.mrb[6].mxu0 }
 0x168   : > { %v560_v54 = vadd.f32 %v1107_v53, %v1684_v34  ;;  %v551_v55 = vpop.f32.mrb[7].mxu0  ;;  %v665_v57 = vmax.f32 %v557_v50, 0.0 }
 0x169   : > { %v552_v56 = vadd.f32 %v1684_v34, %v551_v55  ;;  %v663_v59 = vmax.f32 %v549_v52, 0.0 }
 0x16a   : > { %v666_v58 = vmax.f32 %v560_v54, 0.0 }
 0x16b   : > { %v664_v60 = vmax.f32 %v552_v56, 0.0 }
 0x16c   : > { %v1698_v61 = vpack.c.bf16 %v666_v58, %v665_v57 }
 0x16d   : > { %v1700_v62 = vpack.c.bf16 %v664_v60, %v663_v59  ;;  %v1110_v63 = vpop.f32.mrb[8].mxu0 }
 0x16e   : > { %v573_v0 = vadd.f32 %v1110_v63, %v1684_v34  ;;  %v564_v1 = vpop.f32.mrb[9].mxu0 }
 0x16f   : > { %v565_v2 = vadd.f32 %v1684_v34, %v564_v1  ;;  %v1111_v3 = vpop.f32.mrb[10].mxu0 }
 0x170   : > { %v576_v4 = vadd.f32 %v1111_v3, %v1684_v34  ;;  %v567_v5 = vpop.f32.mrb[11].mxu0  ;;  %v669_v7 = vmax.f32 %v573_v0, 0.0 }
 0x171   : > { %v568_v6 = vadd.f32 %v1684_v34, %v567_v5  ;;  %v667_v9 = vmax.f32 %v565_v2, 0.0 }
 0x172   : > { %v670_v8 = vmax.f32 %v576_v4, 0.0 }
 0x173   : > { %v668_v10 = vmax.f32 %v568_v6, 0.0 }
 0x174   : > { %v1706_v11 = vpack.c.bf16 %v670_v8, %v669_v7 }
 0x175   : > { %v1708_v12 = vpack.c.bf16 %v668_v10, %v667_v9  ;;  %v1114_v13 = vpop.f32.mrb[12].mxu0 }
 0x176   : > { %v589_v14 = vadd.f32 %v1114_v13, %v1684_v34  ;;  %v580_v15 = vpop.f32.mrb[13].mxu0 }
 0x177   : > { %v581_v16 = vadd.f32 %v1684_v34, %v580_v15  ;;  %v1115_v17 = vpop.f32.mrb[14].mxu0 }
 0x178   : > { %v592_v18 = vadd.f32 %v1115_v17, %v1684_v34  ;;  %v583_v19 = vpop.f32.mrb[15].mxu0  ;;  %v673_v21 = vmax.f32 %v589_v14, 0.0 }
 0x179   : > { %v584_v20 = vadd.f32 %v1684_v34, %v583_v19  ;;  %v671_v23 = vmax.f32 %v581_v16, 0.0 }
 0x17a   : > { %v674_v22 = vmax.f32 %v592_v18, 0.0 }
 0x17b   : > { %v672_v24 = vmax.f32 %v584_v20, 0.0 }
 0x17c   : > { %v1714_v25 = vpack.c.bf16 %v674_v22, %v673_v21 }
 0x17d   : > { %v1716_v26 = vpack.c.bf16 %v672_v24, %v671_v23  ;;  %v1118_v27 = vpop.f32.mrb[16].mxu0 }
 0x17e   : > { %v605_v28 = vadd.f32 %v1118_v27, %v1684_v34  ;;  %v596_v30 = vpop.f32.mrb[17].mxu0  ;;  %v1248_v27 = vld [vmem:[#allocation7] sm:$0xff]  }
 0x17f   : > { %v597_v32 = vadd.f32 %v1684_v34, %v596_v30  ;;  %v1119_v35 = vpop.f32.mrb[18].mxu0  ;;  %v1254_v30 = vld [vmem:[#allocation7 + $0x30] sm:$0xff]  }
 0x180   : > { %v608_v36 = vadd.f32 %v1119_v35, %v1684_v34  ;;  %v599_v37 = vpop.f32.mrb[19].mxu0  ;;  %v677_v39 = vmax.f32 %v605_v28, 0.0  ;;  %v1420_v28 = vmov 0.0  }
 0x181   : > { %v600_v38 = vadd.f32 %v1684_v34, %v599_v37  ;;  %v675_v41 = vmax.f32 %v597_v32, 0.0 }
 0x182   : > { %v678_v40 = vmax.f32 %v608_v36, 0.0 }
 0x183   : > { %v676_v42 = vmax.f32 %v600_v38, 0.0 }
 0x184   : > { %v701_v43 = vpack.c.bf16 %v678_v40, %v677_v39  ;;  %v791_v39 = vld [vmem:[%s1802_s5] sm:$0x1] }
 0x185   : > { %v1122_v44 = vpop.f32.mrb[20].mxu0  ;;  %v700_v45 = vpack.c.bf16 %v676_v42, %v675_v41 }
 0x186   : > { %v621_v46 = vadd.f32 %v1122_v44, %v1684_v34  ;;  %v612_v48 = vpop.f32.mrb[21].mxu0 }
 0x187   : > { %v613_v50 = vadd.f32 %v1684_v34, %v612_v48  ;;  %v1123_v51 = vpop.f32.mrb[22].mxu0  ;;  %1053 = vmatprep.subr.bf16.mxu1 %v700_v45 }
 0x188   : > { %v624_v52 = vadd.f32 %v1123_v51, %v1684_v34  ;;  %v615_v53 = vpop.f32.mrb[23].mxu0  ;;  %1054 = vmatpush3.bf16.msra.mxu1 %v1692_v49  ;;  %v681_v55 = vmax.f32 %v621_v46, 0.0 }
 0x189   : > { %v616_v54 = vadd.f32 %v1684_v34, %v615_v53  ;;  %1055 = vmatprep.subr.bf16.mxu1 %v701_v43  ;;  %v679_v57 = vmax.f32 %v613_v50, 0.0 }
 0x18a   : > { %v682_v56 = vmax.f32 %v624_v52, 0.0 }
 0x18b   : > { %v680_v58 = vmax.f32 %v616_v54, 0.0 }
 0x18c   : > { %v703_v59 = vpack.c.bf16 %v682_v56, %v681_v55  ;;  %1056 = vmatpush3.bf16.msra.mxu1 %v1690_v47 }
 0x18d   : > { %v702_v60 = vpack.c.bf16 %v680_v58, %v679_v57  ;;  %v1126_v63 = vpop.f32.mrb[24].mxu0 }
 0x18e   : > { %v637_v0 = vadd.f32 %v1126_v63, %v1684_v34  ;;  %v628_v1 = vpop.f32.mrb[25].mxu0 }
 0x18f   : > { %v629_v2 = vadd.f32 %v1684_v34, %v628_v1  ;;  %v1127_v3 = vpop.f32.mrb[26].mxu0  ;;  %1057 = vmatprep.subr.bf16.mxu1 %v702_v60 }
 0x190   : > { %v640_v49 = vadd.f32 %v1127_v3, %v1684_v34  ;;  %v631_v4 = vpop.f32.mrb[27].mxu0  ;;  %1058 = vmatpush3.bf16.msra.mxu1 %v1700_v62  ;;  %v685_v6 = vmax.f32 %v637_v0, 0.0 }
 0x191   : > { %v632_v5 = vadd.f32 %v1684_v34, %v631_v4  ;;  %1059 = vmatprep.subr.bf16.mxu1 %v703_v59  ;;  %v683_v47 = vmax.f32 %v629_v2, 0.0 }
 0x192   : > { %v686_v7 = vmax.f32 %v640_v49, 0.0 }
 0x193   : > { %v684_v8 = vmax.f32 %v632_v5, 0.0 }
 0x194   : > { %v705_v9 = vpack.c.bf16 %v686_v7, %v685_v6  ;;  %1060 = vmatpush3.bf16.msra.mxu1 %v1698_v61 }
 0x195   : > { %v704_v10 = vpack.c.bf16 %v684_v8, %v683_v47  ;;  %v1130_v13 = vpop.f32.mrb[28].mxu0 }
 0x196   : > { %v653_v14 = vadd.f32 %v1130_v13, %v1684_v34  ;;  %v644_v15 = vpop.f32.mrb[29].mxu0 }
 0x197   : > { %v645_v16 = vadd.f32 %v1684_v34, %v644_v15  ;;  %v1131_v17 = vpop.f32.mrb[30].mxu0  ;;  %1061 = vmatprep.subr.bf16.mxu1 %v704_v10 }
 0x198   : > { %v656_v62 = vadd.f32 %v1131_v17, %v1684_v34  ;;  %v647_v18 = vpop.f32.mrb[31].mxu0  ;;  %1062 = vmatpush3.bf16.msra.mxu1 %v1708_v12  ;;  %v689_v20 = vmax.f32 %v653_v14, 0.0  ;;  %v1250_v12 = vld [vmem:[#allocation7 + $0x10] sm:$0xff]  }
 0x199   : > { %v648_v19 = vadd.f32 %v1684_v34, %v647_v18  ;;  %1063 = vmatprep.subr.bf16.mxu1 %v705_v9  ;;  %v687_v61 = vmax.f32 %v645_v16, 0.0  ;;  %v1249_v34 = vld [vmem:[#allocation7 + $0x8] sm:$0xff]  }
 0x19a   : > { %v690_v21 = vmax.f32 %v656_v62, 0.0 }
 0x19b   : > { %v688_v22 = vmax.f32 %v648_v19, 0.0 }
 0x19c   : > { %v707_v23 = vpack.c.bf16 %v690_v21, %v689_v20  ;;  %1064 = vmatpush3.bf16.msra.mxu1 %v1706_v11  ;;  %v1251_v11 = vld [vmem:[#allocation7 + $0x18] sm:$0xff]  }
 0x19d   : > { %v706_v24 = vpack.c.bf16 %v688_v22, %v687_v61 }
 0x19f   : > { %1065 = vmatprep.subr.bf16.mxu1 %v706_v24 }
 0x1a0   : > { %1066 = vmatpush3.bf16.msra.mxu1 %v1716_v26  ;;  %v1252_v26 = vld [vmem:[#allocation7 + $0x20] sm:$0xff]  }
 0x1a1   : > { %1067 = vmatprep.subr.bf16.mxu1 %v707_v23 }
 0x1a4   : > { %1068 = vmatpush3.bf16.msra.mxu1 %v1714_v25  ;;  %v1253_v25 = vld [vmem:[#allocation7 + $0x28] sm:$0xff]  }
 0x1a5   : > { %1132 = vmatprep.subr.bf16.mxu1 %v1420_v28 }
 0x1a7   : > { %766 = vmatmul.mubr.bf16.vlgmr.msra.gmra.mrb[0].mxu1 %v723_v33 }
 0x1a8   : > { %1133 = vmatpush3.bf16.msra.mxu1 %v1248_v27  ;;  %1148 = vmatprep.mubr.msk.bf16.mxu1 %vm1421_vm0, %v1420_v28 }
 0x1a9   : > { %1134 = vmatprep.subr.bf16.mxu1 %v1420_v28 }
 0x1ac   : > { %1135 = vmatpush3.bf16.msra.mxu1 %v1249_v34 }
 0x1ad   : > { %1136 = vmatprep.subr.bf16.mxu1 %v1420_v28 }
 0x1b0   : > { %1137 = vmatpush3.bf16.msra.mxu1 %v1250_v12 }
 0x1b1   : > { %1138 = vmatprep.subr.bf16.mxu1 %v1420_v28 }
 0x1b4   : > { %1139 = vmatpush3.bf16.msra.mxu1 %v1251_v11 }
 0x1b5   : > { %1140 = vmatprep.subr.bf16.mxu1 %v1420_v28 }
 0x1b8   : > { %1141 = vmatpush3.bf16.msra.mxu1 %v1252_v26 }
 0x1b9   : > { %1142 = vmatprep.subr.bf16.mxu1 %v1420_v28 }
 0x1bc   : > { %1143 = vmatpush3.bf16.msra.mxu1 %v1253_v25 }
 0x1bd   : > { %1144 = vmatprep.subr.bf16.mxu1 %v1420_v28 }
 0x1c0   : > { %1145 = vmatpush3.bf16.msra.mxu1 %v1254_v30 }
 0x1c1   : > { %1146 = vmatprep.subr.bf16.mxu1 %v1420_v28 }
 0x1c4   : > { %1147 = vmatpush3.bf16.msra.mxu1 %v1255_v29 }
 0x27a   : > { %v1069_v31 = vpop.f32.mrb[0].mxu1 }
 0x27b   : > { %v1070_v33 = vpop.f32.mrb[1].mxu1 }
 0x27c   : > { %v1071_v32 = vadd.f32 %v1070_v33, %v1069_v31  ;;  %v1072_v35 = vpop.f32.mrb[2].mxu1 }
 0x27d   : > { %v1073_v36 = vpop.f32.mrb[3].mxu1 }
 0x27e   : > { %v773_v37 = vmul.f32 0.00390625, %v1071_v32 }
 0x280   : > { %v774_v38 = vpack.c.bf16 %v773_v37, %v773_v37 }
 0x282   : > { %1149 = vmatmul.mubr.bf16.vlgmr.msra.gmra.mrb[4].mxu1 %v774_v38 }
 0x355   : > { %v874_v40 = vpop.f32.mrb[4].mxu1 }
 0x356   : > { %v875_v41 = vadd.f32 %v874_v40, %v791_v39  ;;  %v1150_v42 = vpop.f32.mrb[5].mxu1 }
 0x357   : > { %v877_v43 = vpop.f32.mrb[6].mxu1 }
 0x358   : > { %880 = vst [vmem:[%s297_s26] sm:$0x1] %v875_v41  ;;  %v1151_v44 = vpop.f32.mrb[7].mxu1 }
 0x359   : > { %1355 = shalt.err (!%p1352_p1)
}
 0x35a   : > { %s1356_s30 = scalar_lea.hbm %s1753_s14, 16  ;;  %s1360_s16 = scalar_lea.hbm %s1803_s6, 32 }
 0x35b   : > { %p1357_p13 = scmp.ne.s32.totalorder %s1753_s14, %s1356_s30  ;;  %p1361_p4 = scmp.lt.u32.totalorder %s1753_s14, %s1803_s6 }
 0x35c   : > { %p1362_p5 = scmp.lt.u32.totalorder %s1360_s16, %s1356_s30  ;;  %p1364_p11 = scmp.lt.u32.totalorder %s1356_s30, %s1753_s14 }
 0x35d   : > { %p1358_p6 = pnand %p1357_p13, %p1817_p0 }
 0x35e   : > { %p1363_p8 = por %p1362_p5, %p1361_p4 }
 0x35f   : > { %p1359_p10 = pneg %p1358_p6 }
 0x360   : > { %p1365_p2 = por %p1364_p11, %p1363_p8 }
 0x362   : > { %p1366_p3 = pnand %p1365_p2, %p1359_p10 }
 0x364   : > { %1369 = shalt.err (!%p1366_p3)
}
 0x365   : > { %1162 = dma.vmem_to_hbm [thread:$0]  (%p1817_p0), %s1755_s13, 16, %s1753_s14, %s882_s7  }
 0x366 PF: > { %s906_s26 = sand.u32 1, %s1400_s21   ;;  %p1818_p7 = scmp.ne.s32.totalorder %s1808_s28, 0 }
 0x367   : > { %p1819_p9 = scmp.ge.s32.totalorder %s1412_s24, 2  ;;  %s907_s10 = scalar_lea.sflag [#allocation4], %s906_s26 }
 0x369   : > { %p1176_p12 = pnand %p1819_p9, %p1818_p7 }
 0x36b   : > { %1395 = dma.done.wait (!%p1176_p12), %s907_s10, 16  }
 0x36c   : > { %1397 = vsyncadd (!%p1176_p12), %s907_s10, 4294967280  ;;  %p20_p1 = scmp.ge.s32.totalorder %s1574_s8, 4   ;;  %s1820_s21 = smov %s1404_s22 }
 0x36d   : > { %s1821_s22 = smov %s1408_s23  ;;  %s1822_s23 = smov %s1590_s11 }
 0x36e   : > { %s1823_s24 = smov %s1574_s8  ;;  %22 = sbr.rel (!%p20_p1) target bundleno = 6 (0x6), region = 97 }
 0x375   :  { %911 = vsyncpa [#allocation3], 1 }
 0x376   :  { %913 = vsyncpa [#allocation3 + $0x1], 1 }
 0x377   :  { %914 = vsyncpa [#allocation6], 1 }
 0x378   :  { %915 = vsyncpa [#allocation4], 1 }
 0x379   :  { %917 = vsyncpa [#allocation4 + $0x1], 1 }

</bundles_post_ra>
